<compile_context>
chip_gen: v7x
topology: tpu7x:2x2x1
jax: 0.10.0
libtpu: 0.0.40
codegen_flags: <defaults>
</compile_context>

<pallas_src>
import functools

import jax
import jax.numpy as jnp
from jax.experimental import pallas as pl
from jax.experimental.pallas import tpu as pltpu


def _round_up(x, m):
    return (x + m - 1) // m * m


def _integral_kernel(x_ref, p_ref, o_ref):
    """x_ref: (TM, R) logits (wire dtype); p_ref: (R, 1) f32; o_ref: (1, TM)."""
    x = x_ref[...].astype(jnp.float32)               # cast on load (VPU, free under mem-bound)
    xt = pltpu.einshape("mr->rm", x)                  # (R, TM): bins -> sublanes (XLU relayout)
    p = p_ref[...]                                    # (R, 1) f32 projection weights
    m = jnp.max(xt, axis=0, keepdims=True)            # (1, TM) per-distribution max
    e = jnp.exp(xt - m)                               # (R, TM) lane-dense EUP exp
    denom = jnp.sum(e, axis=0, keepdims=True)         # (1, TM)
    numer = jnp.sum(e * p, axis=0, keepdims=True)     # (1, TM) project-weighted sum
    inv = pl.reciprocal(denom, approx=True)           # EUP slot
    inv = inv * (2.0 - denom * inv)                   # one Newton step -> ~f32 exact
    o_ref[...] = (numer * inv).astype(o_ref.dtype)    # lane-dense (1, TM) store


def _choose_row_tile(M, block_rows):
    """Row-tile size: multiple of 128 (or == M for tiny problems), >=2 tiles
    when possible so both v7x TensorCores get work, capped at block_rows."""
    if M <= 128:
        return M                                      # single tile, dims == full array
    m128 = _round_up(M, 128)
    half = _round_up(-(-m128 // 2), 128)              # ceil(m128/2) rounded to 128
    return max(128, min(block_rows, half))


@functools.partial(jax.jit, static_argnames=("reg_max", "block_rows"))
def integral_forward(x, project, *, reg_max, block_rows=8192):
    """Fused softmax-over-bins + `project` weighted sum.

    x: (b, n, c) with c % (reg_max + 1) == 0;  project: (reg_max + 1,)
    returns: (b, n * c // (reg_max + 1), 1), dtype of x.
    """
    R = reg_max + 1
    b, n, c = x.shape
    if c % R != 0:
        raise ValueError(f"last dim {c} must be a multiple of reg_max+1={R}")
    L = n * (c // R)
    M = b * L

    # Free row-major collapse; no astype / transpose / pad HBM passes.
    x2d = x.reshape(M, R)
    proj = project.astype(jnp.float32).reshape(R, 1)  # 33 floats: negligible

    tm = _choose_row_tile(M, block_rows)
    grid = pl.cdiv(M, tm)

    out = pl.pallas_call(
        _integral_kernel,
        out_shape=jax.ShapeDtypeStruct((1, M), x.dtype),
        grid=(grid,),
        in_specs=[
            pl.BlockSpec((tm, R), lambda i: (i, 0)),   # row tile of logits (wire dtype)
            pl.BlockSpec((R, 1), lambda i: (0, 0)),    # project vector (grid-resident)
        ],
        out_specs=pl.BlockSpec((1, tm), lambda i: (0, i)),
        compiler_params=pltpu.CompilerParams(
            dimension_semantics=("parallel",),
            vmem_limit_bytes=32 * 1024 * 1024),
    )(x2d, proj)

    return out.reshape(b, L, 1)


class Integral:
    """Drop-in equivalent of the PyTorch Integral module (forward only)."""

    def __init__(self, reg_max=32):
        self.reg_max = reg_max

    def __call__(self, x, project):
        return integral_forward(x, project, reg_max=self.reg_max)


def integral_ref(x, project, reg_max):
    """Pure-JAX reference mirroring the PyTorch forward (for validation)."""
    prob = jax.nn.softmax(
        x.reshape(x.shape[0], -1, reg_max + 1).astype(jnp.float32), axis=-1)
    return (prob @ project.astype(jnp.float32)[None, :, None]).astype(x.dtype)


if __name__ == "__main__":
    key = jax.random.PRNGKey(0)
    k1, k2, k3 = jax.random.split(key, 3)

    # Config 1: default reg_max=32 (R=33); x: (2, 8, 4*33) -> out (2, 32, 1).
    reg_max = 32
    R = reg_max + 1
    b, n, k_groups = 2, 8, 4
    x = 3.0 * jax.random.normal(k1, (b, n, k_groups * R), jnp.float32)
    project = jnp.linspace(-10.0, 10.0, R, dtype=jnp.float32)

    integral = Integral(reg_max)
    out = integral(x, project)
    jax.block_until_ready(out)
    ref = integral_ref(x, project, reg_max)
    assert out.shape == (b, n * k_groups, 1)
    assert bool(jnp.all(jnp.isfinite(out)))
    assert bool(jnp.allclose(out, ref, rtol=1e-3, atol=1e-3)), (
        float(jnp.max(jnp.abs(out - ref))))

    # Config 2: ContourFormer FDR setting reg_max=8 (R=9); M=576 rows ->
    # 2-tile grid with a ragged last tile (exercises masked edge handling).
    reg_max2 = 8
    R2 = reg_max2 + 1
    b2, n2, k_groups2 = 2, 18, 16
    x2 = 3.0 * jax.random.normal(k2, (b2, n2, k_groups2 * R2), jnp.float32)
    project2 = jnp.linspace(-4.0, 4.0, R2, dtype=jnp.float32)

    integral2 = Integral(reg_max2)
    out2 = integral2(x2, project2)
    jax.block_until_ready(out2)
    ref2 = integral_ref(x2, project2, reg_max2)
    assert out2.shape == (b2, n2 * k_groups2, 1)
    assert bool(jnp.all(jnp.isfinite(out2)))
    assert bool(jnp.allclose(out2, ref2, rtol=1e-3, atol=1e-3)), (
        float(jnp.max(jnp.abs(out2 - ref2))))

    # Config 3: bf16 wire dtype (in-kernel f32 cast, bf16 lane-dense output).
    x3 = (3.0 * jax.random.normal(k3, (b, n, k_groups * R), jnp.float32)
          ).astype(jnp.bfloat16)
    out3 = integral(x3, project)
    jax.block_until_ready(out3)
    ref3 = integral_ref(x3, project, reg_max)
    assert out3.shape == (b, n * k_groups, 1)
    assert out3.dtype == jnp.bfloat16
    d3 = jnp.abs(out3.astype(jnp.float32) - ref3.astype(jnp.float32))
    assert bool(jnp.all(jnp.isfinite(out3)))
    assert bool(jnp.all(d3 <= 0.2 + 0.05 * jnp.abs(ref3.astype(jnp.float32)))), (
        float(jnp.max(d3)))

    print("KERNEL_OK")
</pallas_src>

<mosaic_0001>
module attributes {stable_mosaic.version = 11 : i64} {
  func.func @_integral_kernel(%arg0: i32, %arg1: memref<64x33xf32, #tpu.memory_space<vmem>>, %arg2: memref<33x1xf32, #tpu.memory_space<vmem>>, %arg3: memref<1x64xf32, #tpu.memory_space<vmem>>) attributes {dimension_semantics = [#tpu.dimension_semantics<parallel>], iteration_bounds = array<i64: 1>, scalar_prefetch = 0 : i64, scratch_operands = 0 : i64, tpu.core_type = #tpu.core_type<tc>, window_params = [{transform_indices = @transform_0, window_bounds = array<i64: 64, 33>}, {pipeline_mode = #tpu.pipeline_mode<synchronous>, transform_indices = @transform_1, window_bounds = array<i64: 33, 1>}, {transform_indices = @transform_2, window_bounds = array<i64: 1, 64>}]} {
    %c0 = arith.constant 0 : index
    %c0_0 = arith.constant 0 : index
    %0 = vector.load %arg1[%c0, %c0_0] : memref<64x33xf32, #tpu.memory_space<vmem>>, vector<64x33xf32>
    %1 = tpu.transpose %0, [1, 0] : vector<64x33xf32> -> vector<33x64xf32>
    %c0_1 = arith.constant 0 : index
    %c0_2 = arith.constant 0 : index
    %2 = vector.load %arg2[%c0_1, %c0_2] : memref<33x1xf32, #tpu.memory_space<vmem>>, vector<33x1xf32>
    %cst = arith.constant dense<0xFF800000> : vector<64xf32>
    %3 = vector.multi_reduction <maximumf>, %1, %cst [0] : vector<33x64xf32> to vector<64xf32>
    %4 = vector.shape_cast %3 : vector<64xf32> to vector<1x64xf32>
    %5 = vector.broadcast %4 : vector<1x64xf32> to vector<33x64xf32>
    %6 = arith.subf %1, %5 : vector<33x64xf32>
    %7 = math.exp %6 : vector<33x64xf32>
    %cst_3 = arith.constant dense<0.000000e+00> : vector<64xf32>
    %8 = vector.multi_reduction <add>, %7, %cst_3 [0] : vector<33x64xf32> to vector<64xf32>
    %9 = vector.shape_cast %8 : vector<64xf32> to vector<1x64xf32>
    %10 = vector.broadcast %2 : vector<33x1xf32> to vector<33x64xf32>
    %11 = arith.mulf %7, %10 : vector<33x64xf32>
    %cst_4 = arith.constant dense<0.000000e+00> : vector<64xf32>
    %12 = vector.multi_reduction <add>, %11, %cst_4 [0] : vector<33x64xf32> to vector<64xf32>
    %13 = vector.shape_cast %12 : vector<64xf32> to vector<1x64xf32>
    %14 = tpu.reciprocal %9 {approx = true} : vector<1x64xf32> -> vector<1x64xf32>
    %15 = arith.mulf %9, %14 : vector<1x64xf32>
    %cst_5 = arith.constant 2.000000e+00 : f32
    %16 = vector.broadcast %cst_5 : f32 to vector<1x64xf32>
    %17 = arith.subf %16, %15 : vector<1x64xf32>
    %18 = arith.mulf %14, %17 : vector<1x64xf32>
    %19 = arith.mulf %13, %18 : vector<1x64xf32>
    %c0_6 = arith.constant 0 : index
    %c0_7 = arith.constant 0 : index
    %20 = vector.load %arg3[%c0_6, %c0_7] : memref<1x64xf32, #tpu.memory_space<vmem>>, vector<1x64xf32>
    tpu.vector_store %arg3[%c0_6, %c0_7], %19 {strides = array<i32>} : memref<1x64xf32, #tpu.memory_space<vmem>>, vector<1x64xf32>,
    return
  }
  func.func @transform_0(%arg0: i32) -> (i32, i32) {
    %c0_i32 = arith.constant 0 : i32
    %c0_i32_0 = arith.constant 0 : i32
    return %arg0, %c0_i32 : i32, i32
  }
  func.func @transform_1(%arg0: i32) -> (i32, i32) {
    %c0_i32 = arith.constant 0 : i32
    %c0_i32_0 = arith.constant 0 : i32
    %c0_i32_1 = arith.constant 0 : i32
    return %c0_i32, %c0_i32_0 : i32, i32
  }
  func.func @transform_2(%arg0: i32) -> (i32, i32) {
    %c0_i32 = arith.constant 0 : i32
    %c0_i32_0 = arith.constant 0 : i32
    return %c0_i32, %arg0 : i32, i32
  }
}

</mosaic_0001>

<bundles_post_ra>
// kernel: integral_forward.1
= control target key start
LH: loop header
LB: loop body
LE: loop exit
PB: predicated region body
PF: predicated region fallthrough
CT: control target
= control target key end

     0   :  { %v174_v1 = vmov 0   ;;  %vm56_vm0 = vcmask 523264   ;;  %vm61_vm1 = vcmask 516096   ;;  %s248_s0 = inlined_call_operand.vmem [shape: f32[64,33], index: 0, kind: input, shape index: {}]   ;;  %s249_s1 = inlined_call_operand.vmem [shape: f32[33,1], index: 1, kind: input, shape index: {}]   ;;  %s250_s2 = inlined_call_operand.vmem [shape: f32[1,64], index: 2, kind: output, shape index: {}]  }
   0x1   :  { %v11_v0 = vld [vmem:[%s248_s0] sm:$0xff]  ;;  %160 = vset.pattern.permute.xlu1 %v174_v1  ;;  %v12_v2 = vld [vmem:[%s248_s0 + $0x8] sm:$0xff]  ;;  %v13_v5 = vld [vmem:[%s248_s0 + $0x10] sm:$0xff] }
   0x2   :  { %19 = vxpose.xlu0.b32.start [1/8] (short) (narrow) %v11_v0, 40  ;;  %v51_v3 = vld [vmem:[%s249_s1] sm:$0xff]  ;;  %v52_v4 = vld [vmem:[%s249_s1 + $0x8] sm:$0xff]  ;;  %v53_v6 = vld [vmem:[%s249_s1 + $0x10] sm:$0xff] }
   0x3   :  { %105 = vperm.xlu1 %160, %v51_v3   ;;  %v14_v7 = vld [vmem:[%s248_s0 + $0x18] sm:$0xff]  ;;  %v15_v9 = vld [vmem:[%s248_s0 + $0x20] sm:$0xff]  ;;  %v16_v11 = vld [vmem:[%s248_s0 + $0x28] sm:$0xff] }
   0x4   :  { %v54_v8 = vld [vmem:[%s249_s1 + $0x18] sm:$0xff]  ;;  %v55_v10 = vld [vmem:[%s249_s1 + $0x20] sm:$0x1]  ;;  %v17_v12 = vld [vmem:[%s248_s0 + $0x30] sm:$0xff] }
   0x5   :  { %v18_v13 = vld [vmem:[%s248_s0 + $0x38] sm:$0xff] }
   0x6   :  { %20 = vxpose.xlu0.b32.cont [2/8] (short) (narrow) %v12_v2, 40 }
   0x7   :  { %110 = vperm.xlu1 %160, %v52_v4  }
   0xa   :  { %21 = vxpose.xlu0.b32.cont [3/8] (short) (narrow) %v13_v5, 40 }
   0xb   :  { %115 = vperm.xlu1 %160, %v53_v6  }
   0xe   :  { %22 = vxpose.xlu0.b32.cont [4/8] (short) (narrow) %v14_v7, 40 }
   0xf   :  { %120 = vperm.xlu1 %160, %v54_v8  }
  0x12   :  { %23 = vxpose.xlu0.b32.cont [5/8] (short) (narrow) %v15_v9, 40 }
  0x13   :  { %125 = vperm.xlu1 %160, %v55_v10  }
  0x16   :  { %24 = vxpose.xlu0.b32.cont [6/8] (short) (narrow) %v16_v11, 40 }
  0x1a   :  { %25 = vxpose.xlu0.b32.cont [7/8] (short) (narrow) %v17_v12, 40 }
  0x1e   :  { %26 = vxpose.xlu0.b32.end [8/8] (short) (narrow) %v18_v13, 40 }
  0x47   :  { %161 = vset.pattern.permute.xlu0 %v174_v1 }
  0x82   :  { %v35_v14 = vpop.trf.xlu0  ;;  %v106_v33 = vpop.permute.xlu1 %105 }
  0x83   :  { %v57_v19 = vsel %vm56_vm0, %v35_v14, -inf }
  0x86   :  { %v36_v15 = vpop.trf.xlu0  ;;  %v111_v43 = vpop.permute.xlu1 %110 }
  0x87   :  { %v58_v23 = vsel %vm56_vm0, %v36_v15, -inf }
  0x8a   :  { %v37_v16 = vpop.trf.xlu0  ;;  %v116_v46 = vpop.permute.xlu1 %115 }
  0x8b   :  { %v59_v24 = vsel %vm56_vm0, %v37_v16, -inf }
  0x8e   :  { %v38_v17 = vpop.trf.xlu0  ;;  %v121_v48 = vpop.permute.xlu1 %120 }
  0x8f   :  { %v60_v20 = vsel %vm56_vm0, %v38_v17, -inf }
  0x90   :  { %v65_v25 = vmax.f32 %v59_v24, %v60_v20 }
  0x92   :  { %v39_v18 = vpop.trf.xlu0  ;;  %v126_v3 = vpop.permute.xlu1 %125 }
  0x93   :  { %v62_v21 = vsel %vm61_vm1, %v39_v18, -inf }
  0x94   :  { %v63_v22 = vmax.f32 %v57_v19, %v62_v21 }
  0x96   :  { %v64_v26 = vmax.f32 %v63_v22, %v58_v23 }
  0x98   :  { %v66_v27 = vmax.f32 %v64_v26, %v65_v25 }
  0x9a   :  { %v67_v28 = vrot.slane %v66_v27, 4 }
  0x9c   :  { %v68_v29 = vmax.f32 %v66_v27, %v67_v28 }
  0x9e   :  { %v69_v30 = vrot.slane %v68_v29, 2 }
  0xa0   :  { %v70_v31 = vmax.f32 %v68_v29, %v69_v30 }
  0xa2   :  { %v71_v32 = vrot.slane %v70_v31, 1 }
  0xa4   :  { %v72_v34 = vmax.f32 %v70_v31, %v71_v32 }
  0xa6   :  { %v73_v35 = vsub.f32 %v35_v14, %v72_v34  ;;  %v74_v36 = vsub.f32 %v36_v15, %v72_v34  ;;  %v75_v37 = vsub.f32 %v37_v16, %v72_v34  ;;  %v76_v38 = vsub.f32 %v38_v17, %v72_v34 }
  0xa7   :  { %v77_v39 = vsub.f32 %v39_v18, %v72_v34 }
  0xa8   :  { %v78_v40 = vmul.f32 1.442695, %v73_v35  ;;  %v80_v41 = vmul.f32 1.442695, %v74_v36  ;;  %v82_v42 = vmul.f32 1.442695, %v75_v37 }
  0xa9   :  { %v84_v44 = vmul.f32 1.442695, %v76_v38  ;;  %v86_v45 = vmul.f32 1.442695, %v77_v39 }
  0xaa   :  { %162 = vpow2.f32 %v78_v40 }
  0xab   :  { %164 = vpow2.f32 %v80_v41 }
  0xac   :  { %166 = vpow2.f32 %v82_v42 }
  0xad   :  { %168 = vpow2.f32 %v84_v44 }
  0xae   :  { %170 = vpow2.f32 %v86_v45 }
  0xb4   :  { %v163_v47 = vpop.eup %162 }
  0xb5   :  { %v165_v49 = vpop.eup %164  ;;  %v88_v50 = vsel %vm56_vm0, %v163_v47, 0.0  ;;  %v128_v51 = vmul.f32 %v163_v47, %v106_v33 }
  0xb6   :  { %v167_v52 = vpop.eup %166  ;;  %v89_v53 = vsel %vm56_vm0, %v165_v49, 0.0  ;;  %v129_v54 = vmul.f32 %v165_v49, %v111_v43 }
  0xb7   :  { %v169_v55 = vpop.eup %168  ;;  %v90_v56 = vadd.f32 %v89_v53, %v88_v50  ;;  %v133_v57 = vsel %vm56_vm0, %v128_v51, 0.0  ;;  %v130_v58 = vmul.f32 %v167_v52, %v116_v46  ;;  %v91_v59 = vsel %vm56_vm0, %v167_v52, 0.0 }
  0xb8   :  { %v134_v60 = vsel %vm56_vm0, %v129_v54, 0.0  ;;  %v171_v61 = vpop.eup %170  ;;  %v131_v0 = vmul.f32 %v169_v55, %v121_v48  ;;  %v93_v1 = vsel %vm56_vm0, %v169_v55, 0.0 }
  0xb9   :  { %v92_v62 = vadd.f32 %v91_v59, %v90_v56  ;;  %v135_v63 = vadd.f32 %v134_v60, %v133_v57  ;;  %v136_v2 = vsel %vm56_vm0, %v130_v58, 0.0  ;;  %v95_v6 = vsel %vm61_vm1, %v171_v61, 0.0 }
  0xba   :  { %v138_v8 = vsel %vm56_vm0, %v131_v0, 0.0  ;;  %v132_v9 = vmul.f32 %v171_v61, %v126_v3 }
  0xbb   :  { %v94_v4 = vadd.f32 %v93_v1, %v92_v62  ;;  %v137_v5 = vadd.f32 %v136_v2, %v135_v63 }
  0xbc   :  { %v140_v13 = vsel %vm61_vm1, %v132_v9, 0.0 }
  0xbd   :  { %v96_v7 = vadd.f32 %v95_v6, %v94_v4  ;;  %v139_v10 = vadd.f32 %v138_v8, %v137_v5 }
  0xbf   :  { %v97_v11 = vrot.slane %v96_v7, 4  ;;  %v141_v14 = vadd.f32 %v140_v13, %v139_v10 }
  0xc1   :  { %v98_v12 = vadd.f32 %v97_v11, %v96_v7  ;;  %v142_v17 = vrot.slane %v141_v14, 4 }
  0xc3   :  { %v99_v15 = vrot.slane %v98_v12, 2  ;;  %v143_v20 = vadd.f32 %v142_v17, %v141_v14 }
  0xc5   :  { %v100_v16 = vadd.f32 %v99_v15, %v98_v12  ;;  %v144_v21 = vrot.slane %v143_v20, 2 }
  0xc7   :  { %v101_v18 = vrot.slane %v100_v16, 1  ;;  %v145_v22 = vadd.f32 %v144_v21, %v143_v20 }
  0xc9   :  { %v102_v19 = vadd.f32 %v101_v18, %v100_v16  ;;  %v146_v24 = vrot.slane %v145_v22, 1 }
  0xcb   :  { %172 = vrcp.f32 %v102_v19  ;;  %v147_v27 = vadd.f32 %v146_v24, %v145_v22 }
  0xd5   :  { %v173_v23 = vpop.eup %172 }
  0xd6   :  { %v149_v25 = vmul.f32 %v173_v23, %v102_v19 }
  0xd8   :  { %v150_v26 = vsub.f32 2.0, %v149_v25 }
  0xda   :  { %v151_v28 = vmul.f32 %v173_v23, %v150_v26 }
  0xdc   :  { %v152_v29 = vmul.f32 %v151_v28, %v147_v27 }
  0xde   :  { %153 = vst.msk [vmem:[%s250_s2] sm:$0x1] %vm61_vm1, %v152_v29 }

</bundles_post_ra>
